<compile_context>
chip_gen: v6e
topology: v6e:2x2x1
jax: 0.10.0
libtpu: 0.0.40
codegen_flags: <defaults>
</compile_context>

<pallas_src>
import jax
import jax.numpy as jnp
from jax.experimental import pallas as pl
from jax.experimental.pallas import tpu as pltpu


def _make_group_bn_kernel(eps: float, group_elems: int, norm_in_input_dtype: bool):
    inv_n = 1.0 / float(group_elems)
    inv_nm1 = 1.0 / float(max(group_elems - 1, 1))  # torch .std() is unbiased (n-1)

    def kernel(x_ref, w_ref, b_ref, o_ref):
        # x_ref: (1, gpb, S, L)   w_ref/b_ref: (1, gpb, S, 1)
        xf = x_ref[...].astype(jnp.float32)

        def _group_sum(v):
            # reduce lanes (L) then sublanes (S) -> (1, gpb, 1, 1)
            return jnp.sum(jnp.sum(v, axis=3, keepdims=True), axis=2, keepdims=True)

        # Two-pass statistics (mean, then centered sum of squares) — avoids the
        # catastrophic cancellation of E[x^2] - E[x]^2.
        mean = _group_sum(xf) * jnp.float32(inv_n)                 # (1, gpb, 1, 1)
        centered = xf - mean        # xf's live range ends here on the f32 path
        # TODO(synk): on v5e, chunk this accumulation with lax.fori_loop(unroll=True)
        # over sublane rows so the centered temporaries stay in vregs (single vst slot).
        var = _group_sum(centered * centered) * jnp.float32(inv_nm1)
        std = jnp.sqrt(var)

        # Reciprocal only on the tiny per-group vector; eps is added to std (not
        # folded into var), exactly as in the PyTorch module.
        inv_std = pl.reciprocal(std + jnp.float32(eps), approx=False)

        w = w_ref[...].astype(jnp.float32)                         # (1, gpb, S, 1)
        b = b_ref[...].astype(jnp.float32)
        scale = w * inv_std                                        # (1, gpb, S, 1)

        if norm_in_input_dtype:
            # bf16/fp16 fast path (v6e/v7x): per-element mul+add in the input
            # dtype with folded per-row scale/shift — stats stay in f32 above.
            shift = b - mean * scale
            x_in = x_ref[...]
            o_ref[...] = (x_in * scale.astype(x_in.dtype)
                          + shift.astype(x_in.dtype)).astype(o_ref.dtype)
        else:
            # f32 path: output from `centered` so only one full f32 slab is live
            # through the final lane-dense store (one mul + one add per element).
            o_ref[...] = (centered * scale + b).astype(o_ref.dtype)

    return kernel


def group_batchnorm2d(x, weight, bias, group_num: int = 16, eps: float = 1e-10):
    """x: (N, C, H, W); weight/bias: (C, 1, 1).  Matches PyTorch GroupBatchnorm2d."""
    N, C, H, W = x.shape
    assert C >= group_num and C % group_num == 0
    G = group_num
    Cg = C // G
    HW = H * W
    group_elems = Cg * HW

    # ---- layout: free (contiguous) views of the NCHW slab ---------------------
    if HW % 128 == 0:
        # Lane dim exactly 128, sublanes full: (Cg*HW//128, 128) per group.
        R = HW // 128
        S, L = Cg * R, 128
        x4 = x.reshape(N, G, S, L)
        w4 = jnp.broadcast_to(weight.reshape(1, G, Cg, 1), (1, G, Cg, R)).reshape(1, G, S, 1)
        b4 = jnp.broadcast_to(bias.reshape(1, G, Cg, 1), (1, G, Cg, R)).reshape(1, G, S, 1)
    else:
        # Fallback: lane axis = HW (masked trailing lanes when HW % 128 != 0;
        # sublane padding when Cg < 8).  Still correct, just less vreg-dense.
        S, L = Cg, HW
        x4 = x.reshape(N, G, S, L)
        w4 = weight.reshape(1, G, Cg, 1)
        b4 = bias.reshape(1, G, Cg, 1)

    # ---- generation-aware tiling ----------------------------------------------
    try:
        vmem_cap = int(pltpu.get_tpu_info().vmem_capacity_bytes)
    except Exception:
        vmem_cap = 64 * 1024 * 1024  # conservative default (v7x per-core VMEM)

    # Per group-of-channels VMEM footprint for one block:
    # 2x double-buffered input + 2x double-buffered output + ~2 f32 temp slabs.
    in_bytes_per_group = group_elems * x.dtype.itemsize
    tot_bytes_per_group = 4 * in_bytes_per_group + 2 * group_elems * 4
    vmem_budget = int(0.75 * vmem_cap)        # ~48 MiB on v7x, ~96 MiB on v5e/v6e

    # Keep enough grid steps for megacore sharding (v7x: 2 TCs) and pipelining.
    min_steps = min(8, G * N)

    gpb = 1
    for d in range(G, 0, -1):
        if G % d != 0:
            continue
        if d * tot_bytes_per_group > vmem_budget:
            continue
        if (G // d) * N < min_steps:
            continue
        gpb = d
        break
    # TODO(synk): if a single group exceeds the VMEM budget (very large H*W), add
    # an inner "arbitrary" grid axis over HW chunks with a scratch accumulator and
    # pl.when init/finalize instead of forcing the whole group into one block.
    GB = G // gpb

    needed = gpb * tot_bytes_per_group
    vmem_limit = max(32 * 1024 * 1024, int(needed * 1.25))
    vmem_limit = min(vmem_limit, int(0.9 * vmem_cap))

    norm_in_input_dtype = x.dtype != jnp.float32
    kernel = _make_group_bn_kernel(eps, group_elems, norm_in_input_dtype)

    out = pl.pallas_call(
        kernel,
        out_shape=jax.ShapeDtypeStruct((N, G, S, L), x.dtype),
        grid_spec=pltpu.PrefetchScalarGridSpec(
            num_scalar_prefetch=0,
            # Batch outer, group-blocks innermost: consecutive grid steps stream
            # contiguous HBM addresses within one batch element.
            grid=(N, GB),
            in_specs=[
                pl.BlockSpec((1, gpb, S, L), lambda n, gb: (n, gb, 0, 0)),
                pl.BlockSpec((1, gpb, S, 1), lambda n, gb: (0, gb, 0, 0)),
                pl.BlockSpec((1, gpb, S, 1), lambda n, gb: (0, gb, 0, 0)),
            ],
            out_specs=pl.BlockSpec((1, gpb, S, L), lambda n, gb: (n, gb, 0, 0)),
        ),
        compiler_params=pltpu.CompilerParams(
            dimension_semantics=("parallel", "parallel"),
            vmem_limit_bytes=vmem_limit,
        ),
    )(x4, w4, b4)
    return out.reshape(N, C, H, W)


def group_batchnorm2d_ref(x, weight, bias, group_num: int = 16, eps: float = 1e-10):
    """Pure-JAX reference mirroring the PyTorch forward exactly."""
    N, C, H, W = x.shape
    xg = x.reshape(N, group_num, -1)
    mean = jnp.mean(xg, axis=2, keepdims=True)
    var = jnp.sum((xg - mean) ** 2, axis=2, keepdims=True) / (xg.shape[2] - 1)
    std = jnp.sqrt(var)
    xn = ((xg - mean) / (std + eps)).reshape(N, C, H, W)
    return xn * weight.reshape(1, C, 1, 1) + bias.reshape(1, C, 1, 1)


if __name__ == "__main__":
    key = jax.random.PRNGKey(0)
    kx, kw = jax.random.split(key)
    eps = 1e-10

    # Case 1: HW multiple of 128 -> lane-dense (Cg*HW//128, 128) layout.
    N, C, H, W = 2, 16, 16, 16
    G = 4
    x = jax.random.normal(kx, (N, C, H, W), dtype=jnp.float32)
    # PyTorch init: weight ~ randn(C, 1, 1), bias = zeros(C, 1, 1)
    weight = jax.random.normal(kw, (C, 1, 1), dtype=jnp.float32)
    bias = jnp.zeros((C, 1, 1), dtype=jnp.float32)

    out = jax.block_until_ready(group_batchnorm2d(x, weight, bias, group_num=G, eps=eps))
    ref = group_batchnorm2d_ref(x, weight, bias, group_num=G, eps=eps)
    assert out.shape == (N, C, H, W)
    assert jnp.allclose(out, ref, atol=1e-5, rtol=1e-5), "mismatch vs reference (case 1)"

    # Case 2: HW not a multiple of 128 -> fallback (Cg, HW) layout.
    N2, C2, H2, W2 = 2, 8, 12, 12
    G2 = 2
    x2 = jax.random.normal(kx, (N2, C2, H2, W2), dtype=jnp.float32)
    w2 = jax.random.normal(kw, (C2, 1, 1), dtype=jnp.float32)
    b2 = jnp.zeros((C2, 1, 1), dtype=jnp.float32)

    out2 = jax.block_until_ready(group_batchnorm2d(x2, w2, b2, group_num=G2, eps=eps))
    ref2 = group_batchnorm2d_ref(x2, w2, b2, group_num=G2, eps=eps)
    assert out2.shape == (N2, C2, H2, W2)
    assert jnp.allclose(out2, ref2, atol=1e-5, rtol=1e-5), "mismatch vs reference (case 2)"

    print("KERNEL_OK")
</pallas_src>

<mosaic_0001>
module attributes {stable_mosaic.version = 11 : i64} {
  func.func @kernel(%arg0: i32, %arg1: i32, %arg2: memref<1x1x8x128xf32, #tpu.memory_space<vmem>>, %arg3: memref<1x1x8x1xf32, #tpu.memory_space<vmem>>, %arg4: memref<1x1x8x1xf32, #tpu.memory_space<vmem>>, %arg5: memref<1x1x8x128xf32, #tpu.memory_space<vmem>>) attributes {dimension_semantics = [#tpu.dimension_semantics<parallel>, #tpu.dimension_semantics<parallel>], iteration_bounds = array<i64: 2, 4>, scalar_prefetch = 0 : i64, scratch_operands = 0 : i64, tpu.core_type = #tpu.core_type<tc>, window_params = [{transform_indices = @transform_0, window_bounds = array<i64: 1, 1, 8, 128>}, {transform_indices = @transform_1, window_bounds = array<i64: 1, 1, 8, 1>}, {transform_indices = @transform_2, window_bounds = array<i64: 1, 1, 8, 1>}, {transform_indices = @transform_3, window_bounds = array<i64: 1, 1, 8, 128>}]} {
    %c0 = arith.constant 0 : index
    %c0_0 = arith.constant 0 : index
    %c0_1 = arith.constant 0 : index
    %c0_2 = arith.constant 0 : index
    %0 = vector.load %arg2[%c0, %c0_0, %c0_1, %c0_2] : memref<1x1x8x128xf32, #tpu.memory_space<vmem>>, vector<1x1x8x128xf32>
    %cst = arith.constant dense<0.000000e+00> : vector<1x1x8xf32>
    %1 = vector.multi_reduction <add>, %0, %cst [3] : vector<1x1x8x128xf32> to vector<1x1x8xf32>
    %2 = vector.shape_cast %1 : vector<1x1x8xf32> to vector<1x1x8x1xf32>
    %cst_3 = arith.constant dense<0.000000e+00> : vector<1x1x1xf32>
    %3 = vector.multi_reduction <add>, %2, %cst_3 [2] : vector<1x1x8x1xf32> to vector<1x1x1xf32>
    %4 = vector.shape_cast %3 : vector<1x1x1xf32> to vector<1x1x1x1xf32>
    %cst_4 = arith.constant 9.765625E-4 : f32
    %5 = vector.broadcast %cst_4 : f32 to vector<1x1x1x1xf32>
    %6 = arith.mulf %4, %5 : vector<1x1x1x1xf32>
    %7 = vector.broadcast %6 : vector<1x1x1x1xf32> to vector<1x1x8x128xf32>
    %8 = arith.subf %0, %7 : vector<1x1x8x128xf32>
    %9 = arith.mulf %8, %8 : vector<1x1x8x128xf32>
    %cst_5 = arith.constant dense<0.000000e+00> : vector<1x1x8xf32>
    %10 = vector.multi_reduction <add>, %9, %cst_5 [3] : vector<1x1x8x128xf32> to vector<1x1x8xf32>
    %11 = vector.shape_cast %10 : vector<1x1x8xf32> to vector<1x1x8x1xf32>
    %cst_6 = arith.constant dense<0.000000e+00> : vector<1x1x1xf32>
    %12 = vector.multi_reduction <add>, %11, %cst_6 [2] : vector<1x1x8x1xf32> to vector<1x1x1xf32>
    %13 = vector.shape_cast %12 : vector<1x1x1xf32> to vector<1x1x1x1xf32>
    %cst_7 = arith.constant 9.77517105E-4 : f32
    %14 = vector.broadcast %cst_7 : f32 to vector<1x1x1x1xf32>
    %15 = arith.mulf %13, %14 : vector<1x1x1x1xf32>
    %16 = math.sqrt %15 : vector<1x1x1x1xf32>
    %cst_8 = arith.constant 1.000000e-10 : f32
    %17 = vector.broadcast %cst_8 : f32 to vector<1x1x1x1xf32>
    %18 = arith.addf %16, %17 : vector<1x1x1x1xf32>
    %19 = tpu.reciprocal %18 : vector<1x1x1x1xf32> -> vector<1x1x1x1xf32>
    %c0_9 = arith.constant 0 : index
    %c0_10 = arith.constant 0 : index
    %c0_11 = arith.constant 0 : index
    %c0_12 = arith.constant 0 : index
    %20 = vector.load %arg3[%c0_9, %c0_10, %c0_11, %c0_12] : memref<1x1x8x1xf32, #tpu.memory_space<vmem>>, vector<1x1x8x1xf32>
    %c0_13 = arith.constant 0 : index
    %c0_14 = arith.constant 0 : index
    %c0_15 = arith.constant 0 : index
    %c0_16 = arith.constant 0 : index
    %21 = vector.load %arg4[%c0_13, %c0_14, %c0_15, %c0_16] : memref<1x1x8x1xf32, #tpu.memory_space<vmem>>, vector<1x1x8x1xf32>
    %22 = vector.broadcast %19 : vector<1x1x1x1xf32> to vector<1x1x8x1xf32>
    %23 = arith.mulf %20, %22 : vector<1x1x8x1xf32>
    %24 = vector.broadcast %23 : vector<1x1x8x1xf32> to vector<1x1x8x128xf32>
    %25 = arith.mulf %8, %24 : vector<1x1x8x128xf32>
    %26 = vector.broadcast %21 : vector<1x1x8x1xf32> to vector<1x1x8x128xf32>
    %27 = arith.addf %25, %26 : vector<1x1x8x128xf32>
    %c0_17 = arith.constant 0 : index
    %c0_18 = arith.constant 0 : index
    %c0_19 = arith.constant 0 : index
    %c0_20 = arith.constant 0 : index
    %28 = vector.load %arg5[%c0_17, %c0_18, %c0_19, %c0_20] : memref<1x1x8x128xf32, #tpu.memory_space<vmem>>, vector<1x1x8x128xf32>
    tpu.vector_store %arg5[%c0_17, %c0_18, %c0_19, %c0_20], %27 {strides = array<i32>} : memref<1x1x8x128xf32, #tpu.memory_space<vmem>>, vector<1x1x8x128xf32>,
    return
  }
  func.func @transform_0(%arg0: i32, %arg1: i32) -> (i32, i32, i32, i32) {
    %c0_i32 = arith.constant 0 : i32
    %c0_i32_0 = arith.constant 0 : i32
    %c0_i32_1 = arith.constant 0 : i32
    return %arg0, %arg1, %c0_i32, %c0_i32_0 : i32, i32, i32, i32
  }
  func.func @transform_1(%arg0: i32, %arg1: i32) -> (i32, i32, i32, i32) {
    %c0_i32 = arith.constant 0 : i32
    %c0_i32_0 = arith.constant 0 : i32
    %c0_i32_1 = arith.constant 0 : i32
    %c0_i32_2 = arith.constant 0 : i32
    return %c0_i32, %arg1, %c0_i32_0, %c0_i32_1 : i32, i32, i32, i32
  }
  func.func @transform_2(%arg0: i32, %arg1: i32) -> (i32, i32, i32, i32) {
    %c0_i32 = arith.constant 0 : i32
    %c0_i32_0 = arith.constant 0 : i32
    %c0_i32_1 = arith.constant 0 : i32
    %c0_i32_2 = arith.constant 0 : i32
    return %c0_i32, %arg1, %c0_i32_0, %c0_i32_1 : i32, i32, i32, i32
  }
  func.func @transform_3(%arg0: i32, %arg1: i32) -> (i32, i32, i32, i32) {
    %c0_i32 = arith.constant 0 : i32
    %c0_i32_0 = arith.constant 0 : i32
    %c0_i32_1 = arith.constant 0 : i32
    return %arg0, %arg1, %c0_i32, %c0_i32_0 : i32, i32, i32, i32
  }
}

</mosaic_0001>

<bundles_post_ra>
// kernel: tpu_custom_call.1
= control target key start
LH: loop header
LB: loop body
LE: loop exit
PB: predicated region body
PF: predicated region fallthrough
CT: control target
= control target key end

     0   :  { %8 = vsyncpa [#allocation3], 0  ;;  %s735_s0 = inlined_call_operand.vmem [shape: f32[2,4,8,128], index: 0, kind: input, shape index: {}]   ;;  %s736_s1 = inlined_call_operand.vmem [shape: f32[1,4,8,1], index: 1, kind: input, shape index: {}]   ;;  %s737_s2 = inlined_call_operand.vmem [shape: f32[1,4,8,1], index: 2, kind: input, shape index: {}]   ;;  %s738_s3 = inlined_call_operand.hbm [shape: f32[2,4,8,128], index: 3, kind: output, shape index: {}]  }
   0x1   :  { %10 = vsyncpa [#allocation3 + $0x1], 0  ;;  %s601_s12 = smov 0   ;;  %s603_s13 = smov 0  }
   0x2   :  { %s605_s14 = smov 0   ;;  %s607_s15 = smov 0  }
   0x3   :  { %s609_s16 = smov 0   ;;  %s611_s17 = smov 0  }
   0x4   :  { %s613_s18 = smov 0   ;;  %s615_s19 = smov 0  }
   0x5 LB: > { %s392_s20 = sadd.s32 4294967295, %s577_s19   ;;  %s393_s21 = sadd.s32 4294967294, %s577_s19   ;;  %s577_s19 = sphi %s615_s19, %s16_s19   ;;  %s573_s18 = sphi %s613_s18, %s747_s18   ;;  %s569_s17 = sphi %s611_s17, %s746_s17   ;;  %s565_s16 = sphi %s609_s16, %s745_s16   ;;  %s561_s15 = sphi %s607_s15, %s744_s15   ;;  %s557_s14 = sphi %s605_s14, %s743_s14   ;;  %s553_s13 = sphi %s603_s13, %s742_s13   ;;  %s549_s12 = sphi %s601_s12, %s741_s12  }
   0x6   : > { %s25_s22 = sadd.s32 1, %s569_s17  ;;  %s28_s23 = sadd.s32 1, %s573_s18 }
   0x7   : > { %p26_p0 = scmp.ge.s32.totalorder %s25_s22, 4  ;;  %p127_p1 = scmp.ne.s32.totalorder %s557_s14, %s553_s13 }
   0x8   : > { %p128_p2 = scmp.eq.s32.totalorder %s392_s20, 7  ;;  %p133_p5 = scmp.ne.s32.totalorder %s553_s13, %s549_s12 }
   0x9   : > { %s749_s22 = smov (%p26_p0, %s25_s22), 0  ;;  %s751_s23 = smov (!%p26_p0, %s28_s23), %s573_s18 }
   0xa   : > { %s113_s24 = ssub.s32 %s569_s17, %s749_s22  ;;  %p652_p3 = por %p128_p2, %p127_p1 }
   0xb   : > { %p30_p4 = scmp.ge.s32.totalorder %s751_s23, 2  ;;  %p134_p6 = scmp.eq.s32.totalorder %s393_s21, 7 }
   0xc   : > { %p396_p7 = scmp.ge.s32.totalorder %s577_s19, 1  ;;  %p177_p9 = scmp.lt.s32.totalorder %s577_s19, 9 }
   0xd   : > { %s753_s23 = smov (%p30_p4, %s751_s23), 0  ;;  %p661_p8 = por %p134_p6, %p133_p5 }
   0xe   : > { %s112_s27 = ssub.s32 %s573_s18, %s753_s23  ;;  %s117_s28 = sadd.s32 1, %s557_s14 }
   0xf   : > { %s114_s29 = sor.u32 %s113_s24, %s112_s27  ;;  %p178_p10 = pnand %p396_p7, %p177_p9 }
  0x10   : > { %p115_p11 = scmp.eq.s32.totalorder %s114_s29, 0  ;;  %p212_p12 = scmp.lt.s32.totalorder (!%p178_p10), %s565_s16, 1 }
  0x11   : > { %181 = sbr.rel (%p178_p10) target bundleno = 516 (0x204), region = 32  ;;  %p214_p13 = scmp.lt.s32.totalorder (!%p178_p10), %s561_s15, 3 }
  0x12   : > { %s670_s30 = scalar_select %p115_p11, %s557_s14, %s117_s28  }
  0x16   : > { %s213_s4 = scalar_select %p212_p12, %s565_s16, 1  ;;  %v579_v11 = vmov 0  }
  0x17   : > { %s676_s5 = scalar_select %p214_p13, %s561_s15, 3  ;;  %479 = vset.pattern.permute.xlu1 %v579_v11  ;;  %480 = vset.pattern.permute.xlu0 %v579_v11 }
  0x18   : > { %s398_s6 = sshll.u32 %s213_s4, 2 }
  0x19   : > { %s217_s7 = sadd.s32 %s398_s6, %s676_s5  ;;  %s400_s20 = sshll.u32 %s676_s5, 3 }
  0x1a   : > { %s399_s8 = sshll.u32 %s217_s7, 3  ;;  %s223_s27 = scalar_lea.vmem %s736_s1, %s400_s20 }
  0x1b   : > { %s219_s11 = scalar_lea.vmem %s735_s0, %s399_s8  ;;  %v258_v26 = vld [vmem:[%s223_s27] sm:$0xff]  ;;  %s227_s4 = scalar_lea.vmem %s737_s2, %s400_s20 }
  0x1c   : > { %v228_v0 = vld [vmem:[%s219_s11] sm:$0xff]  ;;  %s209_s6 = sand.u32 1, %s553_s13   ;;  %s403_s8 = sshll.u32 %s565_s16, 2 }
  0x1d   : > { %229 = vadd.xlane.f32.xlu0 %v228_v0  ;;  %v259_v29 = vld [vmem:[%s227_s4] sm:$0xff]  ;;  %s397_s7 = sshll.u32 %s209_s6, 3  ;;  %s286_s9 = sadd.s32 %s561_s15, %s403_s8 }
  0x1e   : > { %s404_s5 = sshll.u32 %s286_s9, 7  ;;  %s211_s10 = scalar_lea.vmem [#allocation2], %s397_s7 }
  0x1f   : > { %s290_s11 = sshll.u32 %s211_s10, 4  ;;  %s288_s27 = scalar_lea.hbm %s738_s3, %s404_s5  ;;  %s291_s11 = int_to_ptr.vmem [resolvable:$true] %s290_s11 }
  0x20   : > { %s275_s20 = scalar_lea.sflag [#allocation3], %s209_s6  ;;  %s485_s28 = scalar_lea.vmem %s291_s11, 128 }
  0x21   : > { %p486_p0 = scmp.ne.s32.totalorder %s291_s11, %s485_s28  ;;  %s580_s15 = smov [#allocation2]  }
  0x22   : > { %s489_s16 = sshll.u32 %s580_s15, 4  ;;  %s490_s16 = int_to_ptr.vmem [resolvable:$false] %s489_s16 }
  0x23   : > { %p487_p1 = pnand %p486_p0, %p652_p3  ;;  %s491_s29 = scalar_lea.vmem %s490_s16, 256 }
  0x24   : > { %p492_p4 = scmp.lt.s32.totalorder %s291_s11, %s490_s16  ;;  %p493_p5 = scmp.lt.s32.totalorder %s491_s29, %s485_s28 }
  0x25   : > { %p488_p2 = pneg %p487_p1 }
  0x26   : > { %p494_p6 = por %p493_p5, %p492_p4 }
  0x28   : > { %p495_p7 = pnand %p494_p6, %p488_p2 }
  0xa6   : > { %v230_v1 = vpop.xlane.xlu0 %229 }
  0xa7   : > { %v231_v2 = vrot.slane %v230_v1, 4 }
  0xa9   : > { %v232_v3 = vadd.f32 %v231_v2, %v230_v1 }
  0xab   : > { %v233_v4 = vrot.slane %v232_v3, 2 }
  0xad   : > { %v234_v5 = vadd.f32 %v233_v4, %v232_v3 }
  0xaf   : > { %v235_v6 = vrot.slane %v234_v5, 1 }
  0xb1   : > { %v236_v7 = vadd.f32 %v235_v6, %v234_v5 }
  0xb3   : > { %v237_v8 = vmul.f32 0.0009765625, %v236_v7 }
  0xb5   : > { %v238_v9 = vsub.f32 %v228_v0, %v237_v8 }
  0xb7   : > { %v239_v10 = vmul.f32 %v238_v9, %v238_v9 }
  0xb9   : > { %240 = vadd.xlane.f32.xlu0 %v239_v10 }
 0x142   : > { %v241_v12 = vpop.xlane.xlu0 %240 }
 0x143   : > { %v242_v13 = vrot.slane %v241_v12, 4 }
 0x145   : > { %v243_v14 = vadd.f32 %v242_v13, %v241_v12 }
 0x147   : > { %v244_v15 = vrot.slane %v243_v14, 2 }
 0x149   : > { %v245_v16 = vadd.f32 %v244_v15, %v243_v14 }
 0x14b   : > { %v246_v17 = vrot.slane %v245_v16, 1 }
 0x14d   : > { %v247_v18 = vadd.f32 %v246_v17, %v245_v16 }
 0x14f   : > { %v248_v19 = vmul.f32 0.0009775171, %v247_v18 }
 0x151   : > { %481 = vrsqrt.f32 %v248_v19  ;;  %vm251_vm0 = vcmp.eq.f32.partialorder %v248_v19, inf  ;;  %v254_v22 = vand.u32 2147483648, %v248_v19  ;;  %vm253_vm1 = vcmp.eq.f32.partialorder %v248_v19, 0.0 }
 0x15e   : > { %v482_v20 = vpop.eup %481 }
 0x15f   : > { %v250_v21 = vmul.f32 %v482_v20, %v248_v19 }
 0x161   : > { %v252_v23 = vsel %vm251_vm0, %v248_v19, %v250_v21 }
 0x162   : > { %v255_v24 = vsel %vm253_vm1, %v254_v22, %v252_v23 }
 0x163   : > { %v256_v25 = vadd.f32 1e-10, %v255_v24 }
 0x165   : > { %483 = vrcp.f32 %v256_v25 }
 0x172   : > { %v484_v27 = vpop.eup %483 }
 0x173   : > { %v260_v28 = vmul.f32 %v484_v27, %v258_v26 }
 0x175   : > { %263 = vperm.xlu1 %479, %v260_v28  }
 0x179   : > { %269 = vperm.xlu1 %479, %v259_v29  }
 0x1f0   : > { %v264_v30 = vpop.permute.xlu1 %263 }
 0x1f1   : > { %v266_v31 = vmul.f32 %v264_v30, %v238_v9 }
 0x1f4   : > { %v270_v32 = vpop.permute.xlu1 %269 }
 0x1f5   : > { %v272_v33 = vadd.f32 %v270_v32, %v266_v31 }
 0x1f7   : > { %273 = vst [vmem:[%s211_s10] sm:$0xff] %v272_v33 }
 0x1f8   : > { %498 = shalt.err (!%p495_p7)
}
 0x1f9   : > { %s499_s4 = scalar_lea.hbm %s288_s27, 128  ;;  %s503_s8 = scalar_lea.hbm %s738_s3, 1024 }
 0x1fa   : > { %p500_p9 = scmp.ne.s32.totalorder %s288_s27, %s499_s4  ;;  %p504_p12 = scmp.lt.s32.totalorder %s288_s27, %s738_s3 }
 0x1fb   : > { %p505_p13 = scmp.lt.s32.totalorder %s503_s8, %s499_s4 }
 0x1fc   : > { %p501_p10 = pnand %p500_p9, %p652_p3 }
 0x1fd   : > { %p506_p0 = por %p505_p13, %p504_p12 }
 0x1fe   : > { %p502_p11 = pneg %p501_p10 }
 0x200   : > { %p507_p1 = pnand %p506_p0, %p502_p11 }
 0x202   : > { %510 = shalt.err (!%p507_p1)
}
 0x203   : > { %407 = dma.vmem_to_hbm [thread:$0]  (%p652_p3), %s291_s11, 128, %s288_s27, %s275_s20  }
 0x204 PF: > { %p413_p2 = scmp.ge.s32.totalorder %s577_s19, 2  ;;  %s302_s10 = sand.u32 1, %s549_s12  }
 0x205   : > { %s303_s21 = scalar_lea.sflag [#allocation3], %s302_s10 }
 0x206   : > { %p410_p4 = pnand %p413_p2, %p661_p8 }
 0x208   : > { %p411_p5 = pneg %p410_p4 }
 0x20a   : > { %544 = dma.done.wait (%p411_p5), %s303_s21, 128  }
 0x20b   : > { %546 = vsyncadd (%p411_p5), %s303_s21, 4294967168  ;;  %s16_s19 = sadd.s32 1, %s577_s19   ;;  %s741_s12 = smov %s553_s13 }
 0x20c   : > { %p13_p6 = scmp.ge.s32.totalorder %s16_s19, 10   ;;  %s742_s13 = smov %s557_s14 }
 0x20d   : > { %s743_s14 = smov %s670_s30  ;;  %s744_s15 = smov %s569_s17 }
 0x20e   : > { %s745_s16 = smov %s573_s18  ;;  %s746_s17 = smov %s749_s22 }
 0x20f   : > { %s747_s18 = smov %s753_s23  ;;  %15 = sbr.rel (!%p13_p6) target bundleno = 5 (0x5), region = 73 }
 0x214   :  { %308 = vsyncpa [#allocation3], 1 }
 0x215   :  { %310 = vsyncpa [#allocation3 + $0x1], 1 }

</bundles_post_ra>
